<compile_context>
chip_gen: v5e
topology: v5e:2x2
jax: 0.10.0
libtpu: 0.0.40
codegen_flags: <defaults>
</compile_context>

<pallas_src>
import functools

import jax
import jax.numpy as jnp
import numpy as np
from jax.experimental import pallas as pl
from jax.experimental.pallas import tpu as pltpu

_LANE = 128


def _round_up(v, m):
    return -(-v // m) * m


def _sse_fused_kernel(xT_ref, uT_ref, wxT_ref, wuT_ref, bcol_ref, w2T_ref, outT_ref, *, hp):
    # z^T: rows [0:hp) = MLP pre-activation (incl. b1), rows [hp:) = [y_k | f(x,u)+b2*std_x]^T
    z = (jnp.dot(wxT_ref[...], xT_ref[...], preferred_element_type=jnp.float32)
         + jnp.dot(wuT_ref[...], uT_ref[...], preferred_element_type=jnp.float32)
         + bcol_ref[...])
    h1 = jnp.tanh(z[:hp, :])                       # (Hp, TB), lane-dense EUP work
    # W2T has zero rows for the y_k slice and zero cols for padded hidden units,
    # so this adds F(x,u) only to the x_plus rows.
    outT_ref[...] = z[hp:, :] + jnp.dot(w2T_ref[...], h1, preferred_element_type=jnp.float32)


def _pick_batch_tile(batch):
    """Lane-aligned batch tile; keeps >=2 grid steps when possible (v7x dual TC)."""
    b_pad = _round_up(max(batch, 1), _LANE)
    if b_pad <= _LANE:
        return b_pad, b_pad                        # tiny batch: single block
    tb = min(1024, max(_LANE, (b_pad // 2) // _LANE * _LANE))
    b_pad = _round_up(b_pad, tb)
    return b_pad, tb


def sse_additive_forward(x, u, params):
    """Returns (y_k, x_plus) exactly as SSE_AdditiveAugmentation.forward."""
    B, Nx = x.shape
    _, Nu = u.shape
    Ny = params["C"].shape[1]
    H = params["W2"].shape[0]
    n_lin = Ny + Nx

    f32 = jnp.float32
    std_x = params["std_x"].reshape(Nx).astype(f32)
    std_u = params["std_u"].reshape(Nu).astype(f32)
    inv_sx = 1.0 / std_x
    inv_su = 1.0 / std_u

    # --- fold the diagonal standardization into the MLP weights (wrapper-side) ---
    W1x_f = params["W1x"].astype(f32) * inv_sx[:, None]            # (Nx, H)
    W1u_f = params["W1u"].astype(f32) * inv_su[:, None]            # (Nu, H)
    W2_f = params["W2"].astype(f32) * std_x[None, :]               # (H, Nx)
    b1 = params["b1"].reshape(H).astype(f32)
    b2_f = params["b2"].reshape(Nx).astype(f32) * std_x            # (Nx,)
    A_m = params["A"].astype(f32)
    B_m = params["B"].astype(f32)
    C_m = params["C"].astype(f32)
    D_m = params["D"].astype(f32)

    # --- sublane-aligned row blocks: [hidden | y_k | x_plus] ---
    Hp = _round_up(H, 8)
    Lp = _round_up(n_lin, 8)
    nz = Hp + Lp

    WxT = jnp.zeros((nz, Nx), f32)
    WxT = WxT.at[:H, :].set(W1x_f.T)
    WxT = WxT.at[Hp:Hp + Ny, :].set(C_m.T)
    WxT = WxT.at[Hp + Ny:Hp + Ny + Nx, :].set(A_m.T)

    WuT = jnp.zeros((nz, Nu), f32)
    WuT = WuT.at[:H, :].set(W1u_f.T)
    WuT = WuT.at[Hp:Hp + Ny, :].set(D_m.T)
    WuT = WuT.at[Hp + Ny:Hp + Ny + Nx, :].set(B_m.T)

    # single bias column: b1 in the hidden rows, b2*std_x folded into the x_plus rows
    b_col = jnp.zeros((nz, 1), f32)
    b_col = b_col.at[:H, 0].set(b1)
    b_col = b_col.at[Hp + Ny:Hp + Ny + Nx, 0].set(b2_f)

    # second layer: zero rows for y_k slice, zero cols for padded hidden units
    W2T = jnp.zeros((Lp, Hp), f32)
    W2T = W2T.at[Ny:Ny + Nx, :H].set(W2_f.T)

    # --- batch-in-lanes inputs (layout plumbing only) ---
    B_pad, TB = _pick_batch_tile(B)
    xT = jnp.pad(x.astype(f32), ((0, B_pad - B), (0, 0))).T        # (Nx, B_pad)
    uT = jnp.pad(u.astype(f32), ((0, B_pad - B), (0, 0))).T        # (Nu, B_pad)

    grid = (B_pad // TB,)
    kernel = functools.partial(_sse_fused_kernel, hp=Hp)

    outT = pl.pallas_call(
        kernel,
        out_shape=jax.ShapeDtypeStruct((Lp, B_pad), f32),
        grid=grid,
        in_specs=[
            pl.BlockSpec((Nx, TB), lambda i: (0, i)),              # x^T: tiled on batch lanes
            pl.BlockSpec((Nu, TB), lambda i: (0, i)),              # u^T: tiled on batch lanes
            pl.BlockSpec((nz, Nx), lambda i: (0, 0)),              # weights: VMEM-resident
            pl.BlockSpec((nz, Nu), lambda i: (0, 0)),
            pl.BlockSpec((nz, 1), lambda i: (0, 0)),
            pl.BlockSpec((Lp, Hp), lambda i: (0, 0)),
        ],
        out_specs=pl.BlockSpec((Lp, TB), lambda i: (0, i)),        # lane-dense writeback
        compiler_params=pltpu.CompilerParams(
            dimension_semantics=("parallel",),
        ),
    )(xT, uT, WxT, WuT, b_col, W2T)

    y_k = outT[:Ny, :B].T
    x_plus = outT[Ny:Ny + Nx, :B].T
    return y_k, x_plus


def _reference(x, u, p):
    x_norm = x / p["std_x"]
    u_norm = u / p["std_u"]
    net_in = jnp.concatenate([x_norm, u_norm], axis=1)
    W1 = jnp.concatenate([p["W1x"], p["W1u"]], axis=0)
    h1 = jnp.tanh(net_in @ W1 + p["b1"])
    F = (h1 @ p["W2"] + p["b2"]) * p["std_x"]
    x_plus = x @ p["A"] + u @ p["B"] + F
    y_k = x @ p["C"] + u @ p["D"]
    return y_k, x_plus


if __name__ == "__main__":
    B, Nx, Nu, Ny, H = 16, 4, 3, 2, 16

    key = jax.random.PRNGKey(0)
    ks = jax.random.split(key, 12)

    x = jax.random.normal(ks[0], (B, Nx), dtype=jnp.float32)
    u = jax.random.normal(ks[1], (B, Nu), dtype=jnp.float32)

    std_x = jnp.abs(jax.random.normal(ks[2], (Nx,), dtype=jnp.float32)) + 0.5
    std_u = jnp.abs(jax.random.normal(ks[3], (Nu,), dtype=jnp.float32)) + 0.5

    params = {
        "std_x": std_x,
        "std_u": std_u,
        # synthetic linear first-principle model f, h
        "A": 0.1 * jax.random.normal(ks[4], (Nx, Nx), dtype=jnp.float32),
        "B": 0.1 * jax.random.normal(ks[5], (Nu, Nx), dtype=jnp.float32),
        "C": 0.1 * jax.random.normal(ks[6], (Nx, Ny), dtype=jnp.float32),
        "D": 0.1 * jax.random.normal(ks[7], (Nu, Ny), dtype=jnp.float32),
        # static MLP net (Linear(Nx+Nu, H) split into x/u parts, tanh, Linear(H, Nx))
        "W1x": 0.1 * jax.random.normal(ks[8], (Nx, H), dtype=jnp.float32),
        "W1u": 0.1 * jax.random.normal(ks[9], (Nu, H), dtype=jnp.float32),
        "b1": 0.01 * jax.random.normal(ks[10], (1, H), dtype=jnp.float32),
        "W2": 0.1 * jax.random.normal(ks[11], (H, Nx), dtype=jnp.float32),
        "b2": jnp.zeros((1, Nx), dtype=jnp.float32),
    }

    y_k, x_plus = sse_additive_forward(x, u, params)
    jax.block_until_ready((y_k, x_plus))

    y_ref, xp_ref = _reference(x, u, params)
    np.testing.assert_allclose(np.asarray(y_k), np.asarray(y_ref), rtol=1e-5, atol=1e-5)
    np.testing.assert_allclose(np.asarray(x_plus), np.asarray(xp_ref), rtol=1e-5, atol=1e-5)

    # TODO(synk): regularization / orthogonalization penalties (regLambda, orthLambda,
    # calculate_orthogonalisation) are training-loss terms, not part of forward().
    print("KERNEL_OK")
</pallas_src>

<mosaic_0001>
module attributes {stable_mosaic.version = 11 : i64} {
  func.func @_sse_fused_kernel(%arg0: i32, %arg1: memref<4x128xf32, #tpu.memory_space<vmem>>, %arg2: memref<3x128xf32, #tpu.memory_space<vmem>>, %arg3: memref<24x4xf32, #tpu.memory_space<vmem>>, %arg4: memref<24x3xf32, #tpu.memory_space<vmem>>, %arg5: memref<24x1xf32, #tpu.memory_space<vmem>>, %arg6: memref<8x16xf32, #tpu.memory_space<vmem>>, %arg7: memref<8x128xf32, #tpu.memory_space<vmem>>) attributes {dimension_semantics = [#tpu.dimension_semantics<parallel>], iteration_bounds = array<i64: 1>, scalar_prefetch = 0 : i64, scratch_operands = 0 : i64, tpu.core_type = #tpu.core_type<tc>, window_params = [{transform_indices = @transform_0, window_bounds = array<i64: 4, 128>}, {transform_indices = @transform_1, window_bounds = array<i64: 3, 128>}, {pipeline_mode = #tpu.pipeline_mode<synchronous>, transform_indices = @transform_2, window_bounds = array<i64: 24, 4>}, {pipeline_mode = #tpu.pipeline_mode<synchronous>, transform_indices = @transform_3, window_bounds = array<i64: 24, 3>}, {pipeline_mode = #tpu.pipeline_mode<synchronous>, transform_indices = @transform_4, window_bounds = array<i64: 24, 1>}, {pipeline_mode = #tpu.pipeline_mode<synchronous>, transform_indices = @transform_5, window_bounds = array<i64: 8, 16>}, {transform_indices = @transform_6, window_bounds = array<i64: 8, 128>}]} {
    %c0 = arith.constant 0 : index
    %c0_0 = arith.constant 0 : index
    %0 = vector.load %arg3[%c0, %c0_0] : memref<24x4xf32, #tpu.memory_space<vmem>>, vector<24x4xf32>
    %c0_1 = arith.constant 0 : index
    %c0_2 = arith.constant 0 : index
    %1 = vector.load %arg1[%c0_1, %c0_2] : memref<4x128xf32, #tpu.memory_space<vmem>>, vector<4x128xf32>
    %cst = arith.constant dense<0.000000e+00> : vector<24x128xf32>
    %2 = tpu.matmul %0, %1, %cst {dimension_numbers = #tpu.dot_dimension_numbers<[1], [0], [0], [1], [0, 0, 1, 1], [], []>} : vector<24x4xf32>, vector<4x128xf32>, vector<24x128xf32> -> vector<24x128xf32>
    %c0_3 = arith.constant 0 : index
    %c0_4 = arith.constant 0 : index
    %3 = vector.load %arg4[%c0_3, %c0_4] : memref<24x3xf32, #tpu.memory_space<vmem>>, vector<24x3xf32>
    %c0_5 = arith.constant 0 : index
    %c0_6 = arith.constant 0 : index
    %4 = vector.load %arg2[%c0_5, %c0_6] : memref<3x128xf32, #tpu.memory_space<vmem>>, vector<3x128xf32>
    %cst_7 = arith.constant dense<0.000000e+00> : vector<24x128xf32>
    %5 = tpu.matmul %3, %4, %cst_7 {dimension_numbers = #tpu.dot_dimension_numbers<[1], [0], [0], [1], [0, 0, 1, 1], [], []>} : vector<24x3xf32>, vector<3x128xf32>, vector<24x128xf32> -> vector<24x128xf32>
    %6 = arith.addf %2, %5 : vector<24x128xf32>
    %c0_8 = arith.constant 0 : index
    %c0_9 = arith.constant 0 : index
    %7 = vector.load %arg5[%c0_8, %c0_9] : memref<24x1xf32, #tpu.memory_space<vmem>>, vector<24x1xf32>
    %8 = vector.broadcast %7 : vector<24x1xf32> to vector<24x128xf32>
    %9 = arith.addf %6, %8 : vector<24x128xf32>
    %10 = vector.extract_strided_slice %9 {offsets = [0, 0], sizes = [16, 128], strides = [1, 1]} : vector<24x128xf32> to vector<16x128xf32>
    %11 = math.tanh %10 : vector<16x128xf32>
    %12 = vector.extract_strided_slice %9 {offsets = [16, 0], sizes = [8, 128], strides = [1, 1]} : vector<24x128xf32> to vector<8x128xf32>
    %c0_10 = arith.constant 0 : index
    %c0_11 = arith.constant 0 : index
    %13 = vector.load %arg6[%c0_10, %c0_11] : memref<8x16xf32, #tpu.memory_space<vmem>>, vector<8x16xf32>
    %cst_12 = arith.constant dense<0.000000e+00> : vector<8x128xf32>
    %14 = tpu.matmul %13, %11, %cst_12 {dimension_numbers = #tpu.dot_dimension_numbers<[1], [0], [0], [1], [0, 0, 1, 1], [], []>} : vector<8x16xf32>, vector<16x128xf32>, vector<8x128xf32> -> vector<8x128xf32>
    %15 = arith.addf %12, %14 : vector<8x128xf32>
    %c0_13 = arith.constant 0 : index
    %c0_14 = arith.constant 0 : index
    %16 = vector.load %arg7[%c0_13, %c0_14] : memref<8x128xf32, #tpu.memory_space<vmem>>, vector<8x128xf32>
    tpu.vector_store %arg7[%c0_13, %c0_14], %15 {strides = array<i32>} : memref<8x128xf32, #tpu.memory_space<vmem>>, vector<8x128xf32>,
    return
  }
  func.func @transform_0(%arg0: i32) -> (i32, i32) {
    %c0_i32 = arith.constant 0 : i32
    %c0_i32_0 = arith.constant 0 : i32
    return %c0_i32, %arg0 : i32, i32
  }
  func.func @transform_1(%arg0: i32) -> (i32, i32) {
    %c0_i32 = arith.constant 0 : i32
    %c0_i32_0 = arith.constant 0 : i32
    return %c0_i32, %arg0 : i32, i32
  }
  func.func @transform_2(%arg0: i32) -> (i32, i32) {
    %c0_i32 = arith.constant 0 : i32
    %c0_i32_0 = arith.constant 0 : i32
    %c0_i32_1 = arith.constant 0 : i32
    return %c0_i32, %c0_i32_0 : i32, i32
  }
  func.func @transform_3(%arg0: i32) -> (i32, i32) {
    %c0_i32 = arith.constant 0 : i32
    %c0_i32_0 = arith.constant 0 : i32
    %c0_i32_1 = arith.constant 0 : i32
    return %c0_i32, %c0_i32_0 : i32, i32
  }
  func.func @transform_4(%arg0: i32) -> (i32, i32) {
    %c0_i32 = arith.constant 0 : i32
    %c0_i32_0 = arith.constant 0 : i32
    %c0_i32_1 = arith.constant 0 : i32
    return %c0_i32, %c0_i32_0 : i32, i32
  }
  func.func @transform_5(%arg0: i32) -> (i32, i32) {
    %c0_i32 = arith.constant 0 : i32
    %c0_i32_0 = arith.constant 0 : i32
    %c0_i32_1 = arith.constant 0 : i32
    return %c0_i32, %c0_i32_0 : i32, i32
  }
  func.func @transform_6(%arg0: i32) -> (i32, i32) {
    %c0_i32 = arith.constant 0 : i32
    %c0_i32_0 = arith.constant 0 : i32
    return %c0_i32, %arg0 : i32, i32
  }
}

</mosaic_0001>

<bundles_post_ra>
// kernel: tpu_custom_call.1
= control target key start
LH: loop header
LB: loop body
LE: loop exit
PB: predicated region body
PF: predicated region fallthrough
CT: control target
= control target key end

     0   :  { %vm42_vm0 = vcmask 1042432   ;;  %vm32_vm1 = vcmask 23552   ;;  %vm82_vm2 = vcmask 1043456   ;;  %vm72_vm3 = vcmask 31744   ;;  %s305_s0 = inlined_call_operand.vmem [shape: f32[4,128], index: 0, kind: input, shape index: {}]   ;;  %s306_s1 = inlined_call_operand.vmem [shape: f32[3,128], index: 1, kind: input, shape index: {}]   ;;  %s307_s2 = inlined_call_operand.vmem [shape: f32[24,4], index: 2, kind: input, shape index: {}]   ;;  %s308_s3 = inlined_call_operand.vmem [shape: f32[24,3], index: 3, kind: input, shape index: {}]   ;;  %s309_s4 = inlined_call_operand.vmem [shape: f32[24,1], index: 4, kind: input, shape index: {}]   ;;  %s310_s5 = inlined_call_operand.vmem [shape: f32[8,16], index: 5, kind: input, shape index: {}]   ;;  %s311_s6 = inlined_call_operand.hbm [shape: f32[8,128], index: 6, kind: output, shape index: {}]  }
   0x1   :  { %v31_v0 = vld [vmem:[%s306_s1] sm:$0x7]  ;;  %v29_v2 = vld [vmem:[%s308_s3 + $0x8] sm:$0xff] }
   0x2   :  { %v28_v1 = vld [vmem:[%s308_s3] sm:$0xff]  ;;  %178 = vmatpush.msk.msra.mxu0 %vm42_vm0, %v31_v0  ;;  %187 = vmatpush.msk.msra.mxu3 %vm42_vm0, %v31_v0  ;;  %v113_v4 = vld [vmem:[%s309_s4 + $0x8] sm:$0xff] }
   0x3   :  { %v27_v3 = vld [vmem:[%s305_s0] sm:$0xf]  ;;  %179 = vmatmul.msk.f32.vlgmr.msra.gmra.mxu0 %vm32_vm1, %v28_v1  ;;  %180 = vmatmul.msk.f32.vlgmr.msra.gmra.mxu3 %vm32_vm1, %v29_v2  ;;  %v25_v5 = vld [vmem:[%s307_s2 + $0x8] sm:$0xff] }
   0x4   :  { %11 = vsyncpa [#allocation3], 0  ;;  %182 = vmatpush.msk.msrb.mxu0 %vm82_vm2, %v27_v3  ;;  %v223_v6 = vmov 0   ;;  %188 = vmatpush.msk.msra.mxu1 %vm82_vm2, %v27_v3  ;;  %v24_v7 = vld [vmem:[%s307_s2] sm:$0xff]  ;;  %v30_v9 = vld [vmem:[%s308_s3 + $0x10] sm:$0xff]  ;;  %vm136_vm4 = vcmask 130048  }
   0x5   :  { %191 = vset.pattern.permute.xlu0 %v223_v6  ;;  %184 = vmatmul.msk.f32.vlgmr.msra.gmra.mxu1 %vm72_vm3, %v25_v5  ;;  %v112_v8 = vld [vmem:[%s309_s4] sm:$0xff]  ;;  %v26_v10 = vld [vmem:[%s307_s2 + $0x10] sm:$0xff]  ;;  %s169_s20 = sshll.u32 %s311_s6, 4  ;;  %s170_s20 = int_to_ptr.hbm [resolvable:$true] %s169_s20 }
   0x6   :  { %122 = vperm.xlu0 %191, %v113_v4   ;;  %192 = vset.pattern.permute.xlu1 %v223_v6  ;;  %v114_v11 = vld [vmem:[%s309_s4 + $0x10] sm:$0xff]  ;;  %v135_v23 = vld [vmem:[%s310_s5] sm:$0xff]  ;;  %s224_s4 = smov [#allocation2]  }
   0x7   :  { %127 = vperm.xlu1 %192, %v114_v11   ;;  %s167_s17 = sshll.u32 %s224_s4, 4  ;;  %s168_s17 = int_to_ptr.vmem [resolvable:$true] %s167_s17 }
   0xb   :  { %183 = vmatmul.msk.f32.vlgmr.msrb.gmra.mxu0 %vm72_vm3, %v24_v7  ;;  %181 = vmatmul.msk.f32.gmra.mxu3 %vm32_vm1, %v30_v9 }
   0xd   :  { %185 = vmatmul.msk.f32.gmra.mxu1 %vm72_vm3, %v26_v10 }
   0xe   :  { %117 = vperm.xlu0 %191, %v112_v8  }
  0x78   :  { %v123_v12 = vpop.permute.xlu0 %122 }
  0x79   :  { %v128_v28 = vpop.permute.xlu1 %127 }
  0x80   :  { %v63_v13 = vpop.f32.mrf.mxu0  ;;  %v118_v20 = vpop.permute.xlu0 %117 }
  0x82   :  { %v106_v14 = vpop.f32.mrf.mxu1 }
  0x86   :  { %v66_v15 = vpop.f32.mrf.mxu3 }
  0x87   :  { %v107_v16 = vadd.f32 %v106_v14, %v66_v15 }
  0x88   :  { %v103_v17 = vpop.f32.mrf.mxu0 }
  0x89   :  { %v104_v18 = vadd.f32 %v103_v17, %v63_v13  ;;  %v131_v19 = vadd.f32 %v123_v12, %v107_v16 }
  0x8a   :  { %v109_v26 = vpop.f32.mrf.mxu1 }
  0x8b   :  { %v130_v21 = vadd.f32 %v118_v20, %v104_v18  ;;  %193 = vtanh.f32 %v131_v19 }
  0x8d   :  { %195 = vtanh.f32 %v130_v21 }
  0x8e   :  { %v69_v25 = vpop.f32.mrf.mxu3 }
  0x8f   :  { %v110_v27 = vadd.f32 %v109_v26, %v69_v25 }
  0x91   :  { %v194_v22 = vpop.eup %193  ;;  %v132_v29 = vadd.f32 %v128_v28, %v110_v27 }
  0x92   :  { %154 = vmatpush.msra.mxu2 %v194_v22 }
  0x93   :  { %v196_v24 = vpop.eup %195 }
  0x94   :  { %155 = vmatpush.msra.mxu2 %v196_v24 }
  0x95   :  { %186 = vmatmul.msk.f32.vlgmr.msra.gmra.mxu2 %vm136_vm4, %v135_v23 }
 0x118   :  { %v157_v30 = vpop.f32.mrf.mxu2 }
 0x119   :  { %v160_v31 = vadd.f32 %v157_v30, %v132_v29 }
 0x11b   :  { %161 = vst [vmem:[#allocation2] sm:$0xff] %v160_v31 }
 0x11c   :  { %172 = dma.vmem_to_hbm [thread:$0]  %s168_s17, 128, %s170_s20, [#allocation3]  }
 0x11d   :  { %221 = dma.done.wait [#allocation3], 128  }
 0x11e   :  { %222 = vsyncadd [#allocation3], 4294967168 }
 0x11f   :  { %177 = vsyncpa [#allocation3], 1 }

</bundles_post_ra>
